<compile_context>
chip_gen: v5e
topology: v5e:2x2
jax: 0.10.0
libtpu: 0.0.40
codegen_flags: <defaults>
</compile_context>

<pallas_src>
import functools

import jax
import jax.numpy as jnp
from jax.experimental import pallas as pl
from jax.experimental.pallas import tpu as pltpu


# ~6 MiB per pipeline buffer; in+out double-buffered = 24 MiB, under the 32 MiB
# explicit scoped-VMEM limit below (valid on v5e/v6e/v7x physical VMEM).
_PER_BUFFER_BYTES = 6 << 20
_VMEM_LIMIT_BYTES = 32 << 20
_LANE_CANDIDATES = (4096, 2048, 1024, 512, 256, 128)
_MIN_ROWS = 8            # sublane minimum for a non-full block
_MIN_GRID_STEPS = 4      # keep the pipeline (and v7x dual-TC) busy


def _quant_math(x, *, qtype, n_exp, n_man, mode, bitcast):
    """Quantization math on an f32 array. `bitcast(v, dtype)` reinterprets bits."""
    if mode not in ("trunc", "round"):
        # TODO(synk): 'stochastic' mode needs pltpu.prng_seed/prng_random_bits plumbing.
        raise NotImplementedError("stochastic mode not implemented")
    rnd = jnp.floor if mode == "trunc" else jnp.round

    if qtype == "fxp":
        # quantization() calls fxp_quant(input, n_int=n_man, n_frac=n_exp).
        n_int, n_frac = n_man, n_exp
        sf = float(2.0 ** n_frac)
        inv_sf = float(2.0 ** (-n_frac))              # exact power of two
        max_val = float(2.0 ** n_int) - float(2.0 ** (-n_frac))
        xt = rnd(x * sf) * inv_sf
        return jnp.clip(xt, -max_val, max_val)

    if qtype == "fp":
        bias = 2 ** (n_exp - 1) - 1
        min_val = float(2.0 ** (-bias + 1)) * float(2.0 ** (-n_man))
        max_val = float(2.0 ** (bias + 1)) * (1.0 + (2 ** n_man - 1) / float(2 ** n_man))
        man_sf = float(2 ** n_man)
        inv_man_sf = float(2.0 ** (-n_man))
        e_floor = -bias + 1
        sign_mask = jnp.int32(-(2 ** 31))

        sign_bits = bitcast(x, jnp.int32) & sign_mask          # saved sign of x
        xabs = jnp.minimum(jnp.abs(x), max_val)                # magnitude clip
        xabs = jnp.where(xabs < min_val, 0.0, xabs)            # flush dead zone
        # floor(log2(|x|)) from the f32 exponent field (exact; surviving non-zero
        # values are >= min_val = 2^-(bias-1+n_man) >> f32 denormals).
        e = (bitcast(xabs, jnp.int32) >> 23) - 127             # zero -> -127
        e = jnp.maximum(e, e_floor)                            # clamp to min exp
        scale = bitcast((e + 127) << 23, jnp.float32)          # exact 2**e
        inv_scale = bitcast((127 - e) << 23, jnp.float32)      # exact 2**-e
        man_t = rnd(xabs * inv_scale * man_sf) * inv_man_sf    # n_man-bit mantissa
        mag = man_t * scale
        # Restore sign by OR-ing the saved sign bit (cheaper than * jnp.sign(x);
        # zeros stay zero since mag == 0 there).
        return bitcast(bitcast(mag, jnp.int32) | sign_bits, jnp.float32)

    raise ValueError(f"unknown quant type {qtype!r}")


def _quant_kernel(x_ref, o_ref, *, qtype, n_exp, n_man, mode):
    # Input is streamed in its native dtype; promote to f32 on the VMEM tile.
    x = x_ref[...].astype(jnp.float32)
    out = _quant_math(x, qtype=qtype, n_exp=n_exp, n_man=n_man, mode=mode,
                      bitcast=pltpu.bitcast)
    o_ref[...] = out.astype(o_ref.dtype)


def _pick_lane(total):
    """Widest lane width dividing `total` that still leaves >= 32 rows; else
    the widest divisor.  `total` is always a multiple of 128 here."""
    widest = None
    for cand in _LANE_CANDIDATES:
        if total % cand == 0:
            if widest is None:
                widest = cand
            if total // cand >= 32:
                return cand
    return widest if widest is not None else 128


def _run_kernel(head, rows, lane, dtype, *, qtype, n_exp, n_man, mode):
    itemsize = jnp.dtype(dtype).itemsize
    budget_rows = max(_MIN_ROWS, (_PER_BUFFER_BYTES // itemsize // lane) // 8 * 8)
    if rows <= _MIN_ROWS:
        block_rows = rows                  # single full-extent block (tiny input)
    else:
        # Cap block_rows so we get >= _MIN_GRID_STEPS grid steps when possible:
        # keeps DMA/compute overlapped and shards across v7x's two TensorCores.
        cap_rows = max(_MIN_ROWS, ((pl.cdiv(rows, _MIN_GRID_STEPS) + 7) // 8) * 8)
        block_rows = min(budget_rows, cap_rows)
    grid = (pl.cdiv(rows, block_rows),)

    kernel = functools.partial(_quant_kernel, qtype=qtype, n_exp=n_exp,
                               n_man=n_man, mode=mode)
    return pl.pallas_call(
        kernel,
        out_shape=jax.ShapeDtypeStruct((rows, lane), dtype),
        grid=grid,
        in_specs=[pl.BlockSpec((block_rows, lane), lambda i: (i, 0))],
        out_specs=pl.BlockSpec((block_rows, lane), lambda i: (i, 0)),
        compiler_params=pltpu.CompilerParams(
            dimension_semantics=("parallel",),
            vmem_limit_bytes=_VMEM_LIMIT_BYTES,
        ),
    )(head.reshape(rows, lane))


def precision_layer(x, *, qtype="fxp", n_exp=5, n_man=10, mode="trunc"):
    """JAX/Pallas equivalent of PrecisionLayer.forward (elementwise quantize)."""
    orig_shape = x.shape
    dtype = x.dtype
    total = x.size
    if total == 0:
        return x

    xf = x.reshape(-1)
    split = (total // 128) * 128          # 128-aligned prefix -> kernel
    pieces = []

    if split:
        lane = _pick_lane(split)
        rows = split // lane
        head_q = _run_kernel(xf[:split], rows, lane, dtype,
                             qtype=qtype, n_exp=n_exp, n_man=n_man, mode=mode)
        pieces.append(head_q.reshape(-1))

    if split != total:
        # <128-element ragged tail: plain jnp (avoids a pad + slice HBM round trip).
        tail = xf[split:].astype(jnp.float32)
        tail_q = _quant_math(tail, qtype=qtype, n_exp=n_exp, n_man=n_man,
                             mode=mode, bitcast=jax.lax.bitcast_convert_type)
        pieces.append(tail_q.astype(dtype))

    out = pieces[0] if len(pieces) == 1 else jnp.concatenate(pieces)
    return out.reshape(orig_shape)


# ---- pure-JAX references (mirror the PyTorch code) --------------------------
def _ref_fxp(x, n_int, n_frac):
    sf = 2.0 ** n_frac
    max_val = 2.0 ** n_int - 2.0 ** (-n_frac)
    return jnp.clip(jnp.floor(x * sf) / sf, -max_val, max_val)


def _ref_fp_log2(x, n_exp, n_man):
    # Faithful transcription of torch fp_quant (log2/exp2 based).
    bias = 2 ** (n_exp - 1) - 1
    exp_min = 2.0 ** (-bias + 1)
    man_max = 1.0 + (2 ** n_man - 1) / 2 ** n_man
    man_min = 2.0 ** (-n_man)
    min_val = exp_min * man_min
    max_val = (2.0 ** (bias + 1)) * man_max
    man_sf = 2.0 ** n_man
    xc = jnp.clip(x, -max_val, max_val)
    xc = jnp.where(jnp.abs(xc) < min_val, 0.0, xc)
    xabs = jnp.abs(xc)
    e = jnp.floor(jnp.log2(xabs))
    e = jnp.maximum(e, float(-bias + 1))
    man = xabs / jnp.exp2(e)
    man_t = jnp.floor(man * man_sf) / man_sf
    return man_t * jnp.exp2(e) * jnp.sign(x)


def _ref_fp_exact(x, n_exp, n_man):
    # Same math with exact floor(log2|x|) via the f32 exponent field.
    return _quant_math(x.astype(jnp.float32), qtype="fp", n_exp=n_exp,
                       n_man=n_man, mode="trunc",
                       bitcast=jax.lax.bitcast_convert_type)


if __name__ == "__main__":
    key = jax.random.PRNGKey(0)
    x = jax.random.normal(key, (2, 4, 16, 16), dtype=jnp.float32) * 3.0

    # default PrecisionLayer: type='fxp', n_exp=5, n_man=10, mode='trunc'
    y_fxp = precision_layer(x, qtype="fxp", n_exp=5, n_man=10, mode="trunc")
    jax.block_until_ready(y_fxp)
    ref_fxp = _ref_fxp(x, n_int=10, n_frac=5)  # arg swap done by quantization()
    assert y_fxp.shape == x.shape and y_fxp.dtype == x.dtype
    assert jnp.allclose(y_fxp, ref_fxp, atol=1e-6)

    # 'fp' path
    y_fp = precision_layer(x, qtype="fp", n_exp=5, n_man=10, mode="trunc")
    jax.block_until_ready(y_fp)
    assert jnp.allclose(y_fp, _ref_fp_exact(x, 5, 10), atol=1e-6)
    # The log2-based torch formulation matches except within ~1 ulp of exact
    # powers of two (log2 rounding may flip the floor); allow one quant step.
    assert jnp.allclose(y_fp, _ref_fp_log2(x, 5, 10), rtol=2e-3, atol=1e-6)

    # bf16 input: exercises native-dtype streaming + in-kernel promotion
    xb = x.astype(jnp.bfloat16)
    y_b = precision_layer(xb, qtype="fxp", n_exp=5, n_man=10, mode="trunc")
    jax.block_until_ready(y_b)
    ref_b = _ref_fxp(xb.astype(jnp.float32), 10, 5).astype(jnp.bfloat16)
    assert y_b.shape == xb.shape and y_b.dtype == jnp.bfloat16
    assert jnp.allclose(
        y_b.astype(jnp.float32), ref_b.astype(jnp.float32), rtol=1e-2, atol=1e-2
    )

    # mid-size tensor exercises the multi-step pipelined grid path
    xm = jax.random.normal(jax.random.PRNGKey(2), (256, 1024), dtype=jnp.float32) * 2.0
    ym = precision_layer(xm, qtype="fxp", n_exp=5, n_man=10, mode="trunc")
    jax.block_until_ready(ym)
    assert jnp.allclose(ym, _ref_fxp(xm, 10, 5), atol=1e-6)

    # ragged size (105 elements) exercises the prefix/tail split path
    x3 = jax.random.normal(jax.random.PRNGKey(1), (3, 5, 7), dtype=jnp.float32)
    y3 = precision_layer(x3, qtype="fxp", n_exp=5, n_man=10, mode="trunc")
    jax.block_until_ready(y3)
    assert jnp.allclose(y3, _ref_fxp(x3, 10, 5), atol=1e-6)

    print("KERNEL_OK")
</pallas_src>

<mosaic_0001>
module attributes {stable_mosaic.version = 11 : i64} {
  func.func @_quant_kernel(%arg0: i32, %arg1: memref<1x2048xf32, #tpu.memory_space<vmem>>, %arg2: memref<1x2048xf32, #tpu.memory_space<vmem>>) attributes {dimension_semantics = [#tpu.dimension_semantics<parallel>], iteration_bounds = array<i64: 1>, scalar_prefetch = 0 : i64, scratch_operands = 0 : i64, tpu.core_type = #tpu.core_type<tc>, window_params = [{transform_indices = @transform_0, window_bounds = array<i64: 1, 2048>}, {transform_indices = @transform_1, window_bounds = array<i64: 1, 2048>}]} {
    %c0 = arith.constant 0 : index
    %c0_0 = arith.constant 0 : index
    %0 = vector.load %arg1[%c0, %c0_0] : memref<1x2048xf32, #tpu.memory_space<vmem>>, vector<1x2048xf32>
    %cst = arith.constant 3.200000e+01 : f32
    %1 = vector.broadcast %cst : f32 to vector<1x2048xf32>
    %2 = arith.mulf %0, %1 : vector<1x2048xf32>
    %3 = math.floor %2 : vector<1x2048xf32>
    %cst_1 = arith.constant 3.125000e-02 : f32
    %4 = vector.broadcast %cst_1 : f32 to vector<1x2048xf32>
    %5 = arith.mulf %3, %4 : vector<1x2048xf32>
    %cst_2 = arith.constant -1023.96875 : f32
    %cst_3 = arith.constant 1023.96875 : f32
    %6 = vector.broadcast %cst_2 : f32 to vector<1x2048xf32>
    %7 = arith.maximumf %6, %5 : vector<1x2048xf32>
    %8 = vector.broadcast %cst_3 : f32 to vector<1x2048xf32>
    %9 = arith.minimumf %8, %7 : vector<1x2048xf32>
    %c0_4 = arith.constant 0 : index
    %c0_5 = arith.constant 0 : index
    %10 = vector.load %arg2[%c0_4, %c0_5] : memref<1x2048xf32, #tpu.memory_space<vmem>>, vector<1x2048xf32>
    tpu.vector_store %arg2[%c0_4, %c0_5], %9 {strides = array<i32>} : memref<1x2048xf32, #tpu.memory_space<vmem>>, vector<1x2048xf32>,
    return
  }
  func.func @transform_0(%arg0: i32) -> (i32, i32) {
    %c0_i32 = arith.constant 0 : i32
    %c0_i32_0 = arith.constant 0 : i32
    return %arg0, %c0_i32 : i32, i32
  }
  func.func @transform_1(%arg0: i32) -> (i32, i32) {
    %c0_i32 = arith.constant 0 : i32
    %c0_i32_0 = arith.constant 0 : i32
    return %arg0, %c0_i32 : i32, i32
  }
}

</mosaic_0001>

<bundles_post_ra>
// kernel: tpu_custom_call.1
= control target key start
LH: loop header
LB: loop body
LE: loop exit
PB: predicated region body
PF: predicated region fallthrough
CT: control target
= control target key end

     0   :  { %6 = vsyncpa [#allocation3], 0  ;;  %s128_s0 = inlined_call_operand.hbm [shape: f32[1,2048], index: 0, kind: input, shape index: {}]   ;;  %s129_s1 = inlined_call_operand.hbm [shape: f32[1,2048], index: 1, kind: output, shape index: {}]  }
   0x1   :  { %7 = vsyncpa [#allocation4], 0  ;;  %s13_s8 = sshll.u32 %s128_s0, 4  ;;  %s110_s9 = smov [#allocation2]   ;;  %s14_s8 = int_to_ptr.hbm [resolvable:$true] %s13_s8 }
   0x2   :  { %s15_s10 = sshll.u32 %s110_s9, 4  ;;  %s16_s10 = int_to_ptr.vmem [resolvable:$true] %s15_s10 }
   0x3   :  { %18 = dma.hbm_to_vmem [thread:$0]  %s14_s8, 256, %s16_s10, [#allocation3]  }
   0x4   :  { %106 = dma.done.wait [#allocation3], 256  }
   0x5   :  { %107 = vsyncadd [#allocation3], 4294967040  ;;  %v23_v0 = vld [vmem:[#allocation2] sm:$0xff]  ;;  %v24_v1 = vld [vmem:[#allocation2 + $0x8] sm:$0xff]  ;;  %s111_s11 = smov [#allocation5]   ;;  %s44_s0 = sshll.u32 %s129_s1, 4  ;;  %s45_s0 = int_to_ptr.hbm [resolvable:$true] %s44_s0 }
   0x6   :  { %v25_v2 = vmul.f32 32.0, %v23_v0  ;;  %v26_v3 = vmul.f32 32.0, %v24_v1  ;;  %s42_s12 = sshll.u32 %s111_s11, 4  ;;  %s43_s12 = int_to_ptr.vmem [resolvable:$true] %s42_s12 }
   0x8   :  { %v27_v4 = vfloor.f32 %v25_v2  ;;  %v28_v5 = vfloor.f32 %v26_v3 }
   0xa   :  { %v29_v6 = vmul.f32 0.03125, %v27_v4  ;;  %v30_v7 = vmul.f32 0.03125, %v28_v5 }
   0xc   :  { %v54_v8 = vclamps-f32 %v29_v6, 1023.96875  ;;  %v55_v9 = vclamps-f32 %v30_v7, 1023.96875 }
   0xe   :  { %35 = vst [vmem:[#allocation5] sm:$0xff] %v54_v8 }
   0xf   :  { %36 = vst [vmem:[#allocation5 + $0x8] sm:$0xff] %v55_v9 }
  0x10   :  { %47 = dma.vmem_to_hbm [thread:$0]  %s43_s12, 256, %s45_s0, [#allocation4]  }
  0x11   :  { %108 = dma.done.wait [#allocation4], 256  }
  0x12   :  { %109 = vsyncadd [#allocation4], 4294967040 }
  0x13   :  { %52 = vsyncpa [#allocation3], 1 }
  0x14   :  { %53 = vsyncpa [#allocation4], 1 }

</bundles_post_ra>
